<compile_context>
chip_gen: v7x
topology: tpu7x:2x2x1
jax: 0.10.0
libtpu: 0.0.40
codegen_flags: <defaults>
</compile_context>

<pallas_src>
import jax
import jax.numpy as jnp
from jax.experimental import pallas as pl
from jax.experimental.pallas import tpu as pltpu

_LANE = 128
_TILE_SUBLANE = 16  # multiple of 16 covers bf16 sublane packing (and f32's 8)

# Cached decision: can this JAX build single-buffer grid-invariant params?  [] = undecided.
_PARAM_MODE_CACHE = []


def _round_up(n, m):
    return ((n + m - 1) // m) * m


def _cdiv(a, b):
    return -(-a // b)


def _pad2(a, rows, cols, dtype):
    a = a.astype(dtype)
    pr, pc = rows - a.shape[0], cols - a.shape[1]
    if pr or pc:
        a = jnp.pad(a, ((0, pr), (0, pc)))
    return a


def _num_tensorcores():
    """Best-effort TensorCore count a single 'parallel' Pallas grid axis can be sharded across."""
    try:
        kind = jax.devices()[0].device_kind.lower()
    except Exception:
        return 2
    # Single-TC chips: grid steps are pure serial overhead -> prefer one big tile.
    if "lite" in kind or "v5e" in kind or "v6e" in kind:
        return 1
    # v7x / megacore chips: balance the batch across both TensorCores.
    return 2


def mlp_kernel(x_ref,
               w1_ref, b1_ref,
               w2_ref, b2_ref,
               w3_ref, b3_ref,
               w4_ref, b4_ref,
               o_ref):
    def dense(h, w_ref, b_ref):
        # bf16 MXU operands, f32 accumulation, f32 bias add.  (x_ref is already bf16;
        # astype is a no-op there and casts the f32 ReLU outputs for the later layers.)
        return jnp.dot(h.astype(jnp.bfloat16), w_ref[...],
                       preferred_element_type=jnp.float32) + b_ref[...]

    # Dropout == identity in eval mode.
    h = jnp.maximum(dense(x_ref[...], w1_ref, b1_ref), 0.0)
    h = jnp.maximum(dense(h, w2_ref, b2_ref), 0.0)
    h = jnp.maximum(dense(h, w3_ref, b3_ref), 0.0)
    z = dense(h, w4_ref, b4_ref)
    # Numerically stable sigmoid: exp(-|z|) <= 1 never overflows.  exp and the approximate
    # reciprocal both run on the EUP, keeping the VPU free for the select/mul.
    ez = jnp.exp(-jnp.abs(z))
    inv = pl.reciprocal(1.0 + ez, approx=True)
    o_ref[...] = jnp.where(z >= 0.0, inv, ez * inv).astype(o_ref.dtype)


def prepare_params(params):
    """Pad feature dims to multiples of 128 and cast weights to bf16 ONCE (outside the hot path).

    params: dict of (in,out) f32 weights 'w1'..'w4' and (1,out) f32 biases 'b1'..'b4'
            (weights stored as PyTorch weight.T).
    """
    Din, H = params["w1"].shape
    C = params["w4"].shape[1]
    Din_p, H_p, C_p = _round_up(Din, _LANE), _round_up(H, _LANE), _round_up(C, _LANE)
    prepared = {
        # Weights as bf16 MXU operands (half DMA/VMEM); biases stay f32 (added to f32 acc).
        "w1": _pad2(params["w1"], Din_p, H_p, jnp.bfloat16),
        "w2": _pad2(params["w2"], H_p, H_p, jnp.bfloat16),
        "w3": _pad2(params["w3"], H_p, H_p, jnp.bfloat16),
        "w4": _pad2(params["w4"], H_p, C_p, jnp.bfloat16),
        "b1": _pad2(params["b1"], 1, H_p, jnp.float32),
        "b2": _pad2(params["b2"], 1, H_p, jnp.float32),
        "b3": _pad2(params["b3"], 1, H_p, jnp.float32),
        "b4": _pad2(params["b4"], 1, C_p, jnp.float32),
        "dims": (Din, H, C, Din_p, H_p, C_p),
    }
    return prepared


def _build_call(batch_tile, grid_n, Din_p, H_p, C_p, param_mode, vmem_limit):
    def pspec(shape):
        # Whole parameter resident every grid step (constant block index).
        if param_mode is None:
            return pl.BlockSpec(shape, lambda i: (0, 0))
        return pl.BlockSpec(shape, lambda i: (0, 0), pipeline_mode=param_mode)

    return pl.pallas_call(
        mlp_kernel,
        out_shape=jax.ShapeDtypeStruct((grid_n * batch_tile, C_p), jnp.float32),
        grid_spec=pltpu.PrefetchScalarGridSpec(
            num_scalar_prefetch=0,
            grid=(grid_n,),
            in_specs=[
                pl.BlockSpec((batch_tile, Din_p), lambda i: (i, 0)),
                pspec((Din_p, H_p)), pspec((1, H_p)),
                pspec((H_p, H_p)), pspec((1, H_p)),
                pspec((H_p, H_p)), pspec((1, H_p)),
                pspec((H_p, C_p)), pspec((1, C_p)),
            ],
            out_specs=pl.BlockSpec((batch_tile, C_p), lambda i: (i, 0)),
        ),
        compiler_params=pltpu.CompilerParams(
            dimension_semantics=("parallel",),
            vmem_limit_bytes=vmem_limit,
        ),
    )


def mlp_forward(x, prepared, *, batch_tile=None, max_batch_tile=2048):
    """x: (B, input_size) f32.  prepared: output of prepare_params()."""
    B, Din = x.shape
    Din0, H0, C0, Din_p, H_p, C_p = prepared["dims"]
    assert Din == Din0, f"input_size mismatch: {Din} vs {Din0}"

    # Batch tiling: one big tile on single-TC chips, balanced 2-way split on 2-TC chips.
    if batch_tile is None:
        batch_tile = _cdiv(B, _num_tensorcores())
    batch_tile = max(_TILE_SUBLANE,
                     _round_up(min(batch_tile, max_batch_tile), _TILE_SUBLANE))
    grid_n = _cdiv(B, batch_tile)
    B_p = grid_n * batch_tile

    # Activations stream as bf16 (halved DMA + VMEM; same cast the reference applies anyway).
    x_p = _pad2(x, B_p, Din_p, jnp.bfloat16)

    # Derive the VMEM budget from the real footprint (worst case: params double-buffered),
    # with 2x headroom, floored at 16 MiB and clamped safely under v7x's 64 MiB physical VMEM.
    weight_bytes = 2 * (Din_p * H_p + 2 * H_p * H_p + H_p * C_p)       # bf16
    bias_bytes = 4 * (3 * H_p + C_p)                                   # f32
    stream_bytes = 2 * batch_tile * (Din_p * 2 + C_p * 4)              # double-buffered x + out
    need = 2 * (weight_bytes + bias_bytes) + stream_bytes
    vmem_limit = int(min(max(2 * need, 16 << 20), 48 << 20))

    args = (x_p,
            prepared["w1"], prepared["b1"],
            prepared["w2"], prepared["b2"],
            prepared["w3"], prepared["b3"],
            prepared["w4"], prepared["b4"])

    if _PARAM_MODE_CACHE:
        out_p = _build_call(batch_tile, grid_n, Din_p, H_p, C_p,
                            _PARAM_MODE_CACHE[0], vmem_limit)(*args)
    else:
        try:
            # Grid-invariant params don't need double buffering -> halve their VMEM footprint.
            out_p = _build_call(batch_tile, grid_n, Din_p, H_p, C_p,
                                pl.Buffered(1), vmem_limit)(*args)
            _PARAM_MODE_CACHE.append(pl.Buffered(1))
        except (TypeError, ValueError, NotImplementedError, pltpu.LoweringException):
            # Narrow fallback: only lowering/shape-style rejections of Buffered(1); cached.
            _PARAM_MODE_CACHE.append(None)
            out_p = _build_call(batch_tile, grid_n, Din_p, H_p, C_p,
                                None, vmem_limit)(*args)

    return out_p[:B, :C0]


def init_params(key, input_size, hidden_size, num_classes):
    """Deterministic init. Weights stored as (in, out) == PyTorch weight.T."""
    keys = jax.random.split(key, 8)

    def lin(kw, kb, fan_in, fan_out):
        bound = 1.0 / jnp.sqrt(fan_in)
        w = jax.random.uniform(kw, (fan_in, fan_out), jnp.float32, -bound, bound)
        b = jax.random.uniform(kb, (1, fan_out), jnp.float32, -bound, bound)
        return w, b

    w1, b1 = lin(keys[0], keys[1], input_size, hidden_size)
    w2, b2 = lin(keys[2], keys[3], hidden_size, hidden_size)
    w3, b3 = lin(keys[4], keys[5], hidden_size, hidden_size)
    w4, b4 = lin(keys[6], keys[7], hidden_size, num_classes)
    return dict(w1=w1, b1=b1, w2=w2, b2=b2, w3=w3, b3=b3, w4=w4, b4=b4)


def mlp_reference(x, p):
    """Pure-JAX reference with the same bf16-operand / f32-accumulate matmul precision."""
    def dense(h, w, b):
        return jnp.dot(h.astype(jnp.bfloat16), w.astype(jnp.bfloat16),
                       preferred_element_type=jnp.float32) + b

    h = jnp.maximum(dense(x, p["w1"], p["b1"]), 0.0)
    h = jnp.maximum(dense(h, p["w2"], p["b2"]), 0.0)
    h = jnp.maximum(dense(h, p["w3"], p["b3"]), 0.0)
    return jax.nn.sigmoid(dense(h, p["w4"], p["b4"]))


if __name__ == "__main__":
    key = jax.random.PRNGKey(0)
    k_x, k_p = jax.random.split(key)

    batch = 200          # deliberately NOT a multiple of the tile -> exercises cdiv/pad path
    input_size = 32
    hidden_size = 32
    num_classes = 4
    dropout = 0.5        # inference mode -> identity

    x = jax.random.normal(k_x, (batch, input_size), dtype=jnp.float32)
    params = init_params(k_p, input_size, hidden_size, num_classes)

    # Pad/cast weights ONCE, outside the per-call hot path.
    prepared = prepare_params(params)

    # Auto tiling: 1 grid step on v5e/v6e, balanced 2-way split (112/88 real rows) on v7x.
    out = mlp_forward(x, prepared)
    out = jax.block_until_ready(out)

    ref = mlp_reference(x, params)
    assert out.shape == (batch, num_classes)
    assert bool(jnp.all(jnp.isfinite(out)))
    err = float(jnp.max(jnp.abs(out - ref)))
    assert err < 5e-3, f"max abs error too large: {err}"

    print("KERNEL_OK")
</pallas_src>

<mosaic_0001>
module attributes {stable_mosaic.version = 11 : i64} {
  func.func @mlp_kernel(%arg0: i32, %arg1: memref<112x128xbf16, #tpu.memory_space<vmem>>, %arg2: memref<128x128xbf16, #tpu.memory_space<vmem>>, %arg3: memref<1x128xf32, #tpu.memory_space<vmem>>, %arg4: memref<128x128xbf16, #tpu.memory_space<vmem>>, %arg5: memref<1x128xf32, #tpu.memory_space<vmem>>, %arg6: memref<128x128xbf16, #tpu.memory_space<vmem>>, %arg7: memref<1x128xf32, #tpu.memory_space<vmem>>, %arg8: memref<128x128xbf16, #tpu.memory_space<vmem>>, %arg9: memref<1x128xf32, #tpu.memory_space<vmem>>, %arg10: memref<112x128xf32, #tpu.memory_space<vmem>>) attributes {dimension_semantics = [#tpu.dimension_semantics<parallel>], iteration_bounds = array<i64: 2>, scalar_prefetch = 0 : i64, scratch_operands = 0 : i64, tpu.core_type = #tpu.core_type<tc>, window_params = [{transform_indices = @transform_0, window_bounds = array<i64: 112, 128>}, {pipeline_mode = #tpu.pipeline_mode<synchronous>, transform_indices = @transform_1, window_bounds = array<i64: 128, 128>}, {pipeline_mode = #tpu.pipeline_mode<synchronous>, transform_indices = @transform_2, window_bounds = array<i64: 1, 128>}, {pipeline_mode = #tpu.pipeline_mode<synchronous>, transform_indices = @transform_3, window_bounds = array<i64: 128, 128>}, {pipeline_mode = #tpu.pipeline_mode<synchronous>, transform_indices = @transform_4, window_bounds = array<i64: 1, 128>}, {pipeline_mode = #tpu.pipeline_mode<synchronous>, transform_indices = @transform_5, window_bounds = array<i64: 128, 128>}, {pipeline_mode = #tpu.pipeline_mode<synchronous>, transform_indices = @transform_6, window_bounds = array<i64: 1, 128>}, {pipeline_mode = #tpu.pipeline_mode<synchronous>, transform_indices = @transform_7, window_bounds = array<i64: 128, 128>}, {pipeline_mode = #tpu.pipeline_mode<synchronous>, transform_indices = @transform_8, window_bounds = array<i64: 1, 128>}, {transform_indices = @transform_9, window_bounds = array<i64: 112, 128>}]} {
    %c0 = arith.constant 0 : index
    %c0_0 = arith.constant 0 : index
    %0 = vector.load %arg1[%c0, %c0_0] : memref<112x128xbf16, #tpu.memory_space<vmem>>, vector<112x128xbf16>
    %c0_1 = arith.constant 0 : index
    %c0_2 = arith.constant 0 : index
    %1 = vector.load %arg2[%c0_1, %c0_2] : memref<128x128xbf16, #tpu.memory_space<vmem>>, vector<128x128xbf16>
    %cst = arith.constant dense<0.000000e+00> : vector<112x128xf32>
    %2 = tpu.matmul %0, %1, %cst {dimension_numbers = #tpu.dot_dimension_numbers<[1], [0], [0], [1], [0, 0, 1, 1], [], []>} : vector<112x128xbf16>, vector<128x128xbf16>, vector<112x128xf32> -> vector<112x128xf32>
    %c0_3 = arith.constant 0 : index
    %c0_4 = arith.constant 0 : index
    %3 = vector.load %arg3[%c0_3, %c0_4] : memref<1x128xf32, #tpu.memory_space<vmem>>, vector<1x128xf32>
    %4 = vector.broadcast %3 : vector<1x128xf32> to vector<112x128xf32>
    %5 = arith.addf %2, %4 : vector<112x128xf32>
    %cst_5 = arith.constant 0.000000e+00 : f32
    %6 = vector.broadcast %cst_5 : f32 to vector<112x128xf32>
    %7 = arith.maximumf %5, %6 : vector<112x128xf32>
    %8 = arith.truncf %7 : vector<112x128xf32> to vector<112x128xbf16>
    %c0_6 = arith.constant 0 : index
    %c0_7 = arith.constant 0 : index
    %9 = vector.load %arg4[%c0_6, %c0_7] : memref<128x128xbf16, #tpu.memory_space<vmem>>, vector<128x128xbf16>
    %cst_8 = arith.constant dense<0.000000e+00> : vector<112x128xf32>
    %10 = tpu.matmul %8, %9, %cst_8 {dimension_numbers = #tpu.dot_dimension_numbers<[1], [0], [0], [1], [0, 0, 1, 1], [], []>} : vector<112x128xbf16>, vector<128x128xbf16>, vector<112x128xf32> -> vector<112x128xf32>
    %c0_9 = arith.constant 0 : index
    %c0_10 = arith.constant 0 : index
    %11 = vector.load %arg5[%c0_9, %c0_10] : memref<1x128xf32, #tpu.memory_space<vmem>>, vector<1x128xf32>
    %12 = vector.broadcast %11 : vector<1x128xf32> to vector<112x128xf32>
    %13 = arith.addf %10, %12 : vector<112x128xf32>
    %cst_11 = arith.constant 0.000000e+00 : f32
    %14 = vector.broadcast %cst_11 : f32 to vector<112x128xf32>
    %15 = arith.maximumf %13, %14 : vector<112x128xf32>
    %16 = arith.truncf %15 : vector<112x128xf32> to vector<112x128xbf16>
    %c0_12 = arith.constant 0 : index
    %c0_13 = arith.constant 0 : index
    %17 = vector.load %arg6[%c0_12, %c0_13] : memref<128x128xbf16, #tpu.memory_space<vmem>>, vector<128x128xbf16>
    %cst_14 = arith.constant dense<0.000000e+00> : vector<112x128xf32>
    %18 = tpu.matmul %16, %17, %cst_14 {dimension_numbers = #tpu.dot_dimension_numbers<[1], [0], [0], [1], [0, 0, 1, 1], [], []>} : vector<112x128xbf16>, vector<128x128xbf16>, vector<112x128xf32> -> vector<112x128xf32>
    %c0_15 = arith.constant 0 : index
    %c0_16 = arith.constant 0 : index
    %19 = vector.load %arg7[%c0_15, %c0_16] : memref<1x128xf32, #tpu.memory_space<vmem>>, vector<1x128xf32>
    %20 = vector.broadcast %19 : vector<1x128xf32> to vector<112x128xf32>
    %21 = arith.addf %18, %20 : vector<112x128xf32>
    %cst_17 = arith.constant 0.000000e+00 : f32
    %22 = vector.broadcast %cst_17 : f32 to vector<112x128xf32>
    %23 = arith.maximumf %21, %22 : vector<112x128xf32>
    %24 = arith.truncf %23 : vector<112x128xf32> to vector<112x128xbf16>
    %c0_18 = arith.constant 0 : index
    %c0_19 = arith.constant 0 : index
    %25 = vector.load %arg8[%c0_18, %c0_19] : memref<128x128xbf16, #tpu.memory_space<vmem>>, vector<128x128xbf16>
    %cst_20 = arith.constant dense<0.000000e+00> : vector<112x128xf32>
    %26 = tpu.matmul %24, %25, %cst_20 {dimension_numbers = #tpu.dot_dimension_numbers<[1], [0], [0], [1], [0, 0, 1, 1], [], []>} : vector<112x128xbf16>, vector<128x128xbf16>, vector<112x128xf32> -> vector<112x128xf32>
    %c0_21 = arith.constant 0 : index
    %c0_22 = arith.constant 0 : index
    %27 = vector.load %arg9[%c0_21, %c0_22] : memref<1x128xf32, #tpu.memory_space<vmem>>, vector<1x128xf32>
    %28 = vector.broadcast %27 : vector<1x128xf32> to vector<112x128xf32>
    %29 = arith.addf %26, %28 : vector<112x128xf32>
    %30 = math.absf %29 : vector<112x128xf32>
    %cst_23 = arith.constant 0.000000e+00 : f32
    %31 = vector.broadcast %cst_23 : f32 to vector<112x128xf32>
    %32 = arith.subf %31, %30 : vector<112x128xf32>
    %33 = math.exp %32 : vector<112x128xf32>
    %cst_24 = arith.constant 1.000000e+00 : f32
    %34 = vector.broadcast %cst_24 : f32 to vector<112x128xf32>
    %35 = arith.addf %34, %33 : vector<112x128xf32>
    %36 = tpu.reciprocal %35 {approx = true} : vector<112x128xf32> -> vector<112x128xf32>
    %cst_25 = arith.constant 0.000000e+00 : f32
    %37 = vector.broadcast %cst_25 : f32 to vector<112x128xf32>
    %38 = arith.cmpf oge, %29, %37 : vector<112x128xf32>
    %39 = arith.mulf %33, %36 : vector<112x128xf32>
    %40 = arith.select %38, %36, %39 : vector<112x128xi1>, vector<112x128xf32>
    %c0_26 = arith.constant 0 : index
    %c0_27 = arith.constant 0 : index
    %41 = vector.load %arg10[%c0_26, %c0_27] : memref<112x128xf32, #tpu.memory_space<vmem>>, vector<112x128xf32>
    tpu.vector_store %arg10[%c0_26, %c0_27], %40 {strides = array<i32>} : memref<112x128xf32, #tpu.memory_space<vmem>>, vector<112x128xf32>,
    return
  }
  func.func @transform_0(%arg0: i32) -> (i32, i32) {
    %c0_i32 = arith.constant 0 : i32
    %c0_i32_0 = arith.constant 0 : i32
    return %arg0, %c0_i32 : i32, i32
  }
  func.func @transform_1(%arg0: i32) -> (i32, i32) {
    %c0_i32 = arith.constant 0 : i32
    %c0_i32_0 = arith.constant 0 : i32
    %c0_i32_1 = arith.constant 0 : i32
    return %c0_i32, %c0_i32_0 : i32, i32
  }
  func.func @transform_2(%arg0: i32) -> (i32, i32) {
    %c0_i32 = arith.constant 0 : i32
    %c0_i32_0 = arith.constant 0 : i32
    %c0_i32_1 = arith.constant 0 : i32
    return %c0_i32, %c0_i32_0 : i32, i32
  }
  func.func @transform_3(%arg0: i32) -> (i32, i32) {
    %c0_i32 = arith.constant 0 : i32
    %c0_i32_0 = arith.constant 0 : i32
    %c0_i32_1 = arith.constant 0 : i32
    return %c0_i32, %c0_i32_0 : i32, i32
  }
  func.func @transform_4(%arg0: i32) -> (i32, i32) {
    %c0_i32 = arith.constant 0 : i32
    %c0_i32_0 = arith.constant 0 : i32
    %c0_i32_1 = arith.constant 0 : i32
    return %c0_i32, %c0_i32_0 : i32, i32
  }
  func.func @transform_5(%arg0: i32) -> (i32, i32) {
    %c0_i32 = arith.constant 0 : i32
    %c0_i32_0 = arith.constant 0 : i32
    %c0_i32_1 = arith.constant 0 : i32
    return %c0_i32, %c0_i32_0 : i32, i32
  }
  func.func @transform_6(%arg0: i32) -> (i32, i32) {
    %c0_i32 = arith.constant 0 : i32
    %c0_i32_0 = arith.constant 0 : i32
    %c0_i32_1 = arith.constant 0 : i32
    return %c0_i32, %c0_i32_0 : i32, i32
  }
  func.func @transform_7(%arg0: i32) -> (i32, i32) {
    %c0_i32 = arith.constant 0 : i32
    %c0_i32_0 = arith.constant 0 : i32
    %c0_i32_1 = arith.constant 0 : i32
    return %c0_i32, %c0_i32_0 : i32, i32
  }
  func.func @transform_8(%arg0: i32) -> (i32, i32) {
    %c0_i32 = arith.constant 0 : i32
    %c0_i32_0 = arith.constant 0 : i32
    %c0_i32_1 = arith.constant 0 : i32
    return %c0_i32, %c0_i32_0 : i32, i32
  }
  func.func @transform_9(%arg0: i32) -> (i32, i32) {
    %c0_i32 = arith.constant 0 : i32
    %c0_i32_0 = arith.constant 0 : i32
    return %arg0, %c0_i32 : i32, i32
  }
}

</mosaic_0001>

<bundles_post_ra>
// kernel: tpu_custom_call.1
= control target key start
LH: loop header
LB: loop body
LE: loop exit
PB: predicated region body
PF: predicated region fallthrough
CT: control target
= control target key end

     0   :  { %s2743_s0 = inlined_call_operand.hbm [shape: bf16[224,128], index: 0, kind: input, shape index: {}]   ;;  %s2744_s1 = inlined_call_operand.hbm [shape: bf16[128,128], index: 1, kind: input, shape index: {}]   ;;  %s2745_s2 = inlined_call_operand.vmem [shape: f32[1,128], index: 2, kind: input, shape index: {}]   ;;  %s2746_s3 = inlined_call_operand.hbm [shape: bf16[128,128], index: 3, kind: input, shape index: {}]   ;;  %s2747_s4 = inlined_call_operand.vmem [shape: f32[1,128], index: 4, kind: input, shape index: {}]   ;;  %s2748_s5 = inlined_call_operand.hbm [shape: bf16[128,128], index: 5, kind: input, shape index: {}]   ;;  %s2749_s6 = inlined_call_operand.vmem [shape: f32[1,128], index: 6, kind: input, shape index: {}]   ;;  %s2750_s7 = inlined_call_operand.hbm [shape: bf16[128,128], index: 7, kind: input, shape index: {}]   ;;  %s2751_s8 = inlined_call_operand.vmem [shape: f32[1,128], index: 8, kind: input, shape index: {}]   ;;  %s2752_s9 = inlined_call_operand.hbm [shape: f32[224,128], index: 9, kind: output, shape index: {}]  }
   0x1   :  { %2761 = sst [smem:[#allocation18_spill]] %s2752_s9 }
   0x2   :  { %14 = vsyncpa [#allocation3], 0 }
   0x3   :  { %16 = vsyncpa [#allocation3 + $0x1], 0 }
   0x4   :  { %17 = vsyncpa [#allocation6], 0 }
   0x5   :  { %18 = vsyncpa [#allocation9], 0 }
   0x6   :  { %19 = vsyncpa [#allocation4], 0 }
   0x7   :  { %21 = vsyncpa [#allocation4 + $0x1], 0  ;;  %s2204_s30 = smov 0   ;;  %s2206_s10 = smov 0  }
   0x8   :  { %s2208_s11 = smov 0   ;;  %s2210_s12 = smov 0  }
   0x9 LB: > { %2762 = sst [smem:[#allocation16_spill]] %s2128_s30  ;;  %s2225_s13 = sadd.s32 4294967295, %s2140_s12   ;;  %s2140_s12 = sphi %s2210_s12, %s2788_s12   ;;  %s2136_s11 = sphi %s2208_s11, %s2787_s11   ;;  %s2132_s10 = sphi %s2206_s10, %s2786_s10   ;;  %s2128_s30 = sphi %s2204_s30, %s2785_s30  }
   0xa   : > { %s1436_s14 = sadd.s32 4294967294, %s2140_s12   ;;  %p47_p0 = scmp.ne.s32.totalorder %s2132_s10, %s2128_s30 }
   0xb   : > { %p2753_p1 = scmp.eq.s32.totalorder %s2225_s13, 0  ;;  %p245_p3 = scmp.eq.s32.totalorder %s1436_s14, 1 }
   0xc   : > { %p1437_p5 = scmp.ge.s32.totalorder %s2140_s12, 1  ;;  %p252_p7 = scmp.lt.s32.totalorder %s2140_s12, 3 }
   0xd   : > { %p2234_p4 = por %p2753_p1, %p47_p0  ;;  %p2239_p6 = por %p245_p3, %p47_p0 }
   0xe   : > { %p2244_p8 = pnand %p1437_p5, %p252_p7  ;;  %s2142_s18 = smov [#allocation5]  }
   0xf   : > { %s2763_s15 = scalar_select %p2234_p4, 1, 0 }
  0x10   : > { %s2764_s16 = scalar_select %p2239_p6, 1, 0 }
  0x11   : > { %s2766_s17 = scalar_select %p2244_p8, 1, 0 }
  0x12   : > { %2765 = sst [smem:[#allocation17_spill]] %s2764_s16  ;;  %s264_s19 = sshll.u32 %s2142_s18, 4  ;;  %s2248_s19 = int_to_ptr.vmem [resolvable:$true] %s264_s19 }
  0x13   : > { %p1756_p9 = pneg %p2244_p8  ;;  %s2143_s21 = smov [#allocation8]  }
  0x14   : > { %s296_s22 = sshll.u32 %s2143_s21, 4  ;;  %s2144_s23 = smov [#allocation7]   ;;  %s2259_s22 = int_to_ptr.vmem [resolvable:$true] %s296_s22 }
  0x15   : > { %p2255_p11 = pnand %p1756_p9, %p2753_p1  ;;  %s2261_s24 = sshll.u32 %s2144_s23, 4  ;;  %s281_s24 = int_to_ptr.vmem [resolvable:$true] %s2261_s24 }
  0x16   : > { %s1924_s27 = scalar_lea.hbm %s2744_s1, 1024 }
  0x17   : > { %p1925_p12 = scmp.ne.s32.totalorder %s2744_s1, %s1924_s27  ;;  %p2271_p13 = pneg %p2255_p11 }
  0x18   : > { %p1931_p5 = scmp.lt.u32.totalorder %s1924_s27, %s2744_s1 }
  0x19   : > { %p1927_p0 = pnand %p2271_p13, %p1925_p12 }
  0x1b   : > { %p1928_p3 = pneg %p1927_p0 }
  0x1d   : > { %p1933_p7 = pnand %p1931_p5, %p1928_p3 }
  0x1f   : > { %1936 = shalt.err (!%p1933_p7)
}
  0x20   : > { %s1937_s23 = scalar_lea.vmem %s2248_s19, 1024  ;;  %p1945_p2 = scmp.lt.s32.totalorder %s2248_s19, %s2248_s19 }
  0x21   : > { %p1938_p9 = scmp.ne.s32.totalorder %s2248_s19, %s1937_s23  ;;  %p1946_p6 = scmp.lt.s32.totalorder %s1937_s23, %s1937_s23 }
  0x23   : > { %p1940_p10 = pnand %p1938_p9, %p2271_p13  ;;  %p1947_p12 = por %p1946_p6, %p1945_p2 }
  0x25   : > { %p1941_p1 = pneg %p1940_p10 }
  0x27   : > { %p1948_p0 = pnand %p1947_p12, %p1941_p1 }
  0x29   : > { %1951 = shalt.err (!%p1948_p0)
}
  0x2a   : > { %s2759_s25 = smov 64   ;;  %s2760_s26 = smov 4  }
  0x2b   : > { %1759 = dma.hbm_to_vmem [thread:$0]  (!%p2255_p11), %s2744_s1, 1024, %s2248_s19, [#allocation6], %s2759_s25, %s2759_s25, %s2760_s26  }
  0x2c   : > { %s1952_s21 = scalar_lea.hbm %s2748_s5, 1024 }
  0x2d   : > { %p1953_p1 = scmp.ne.s32.totalorder %s2748_s5, %s1952_s21  ;;  %p1959_p10 = scmp.lt.u32.totalorder %s1952_s21, %s2748_s5 }
  0x2f   : > { %p1955_p2 = pnand %p1953_p1, %p2271_p13 }
  0x31   : > { %p1956_p6 = pneg %p1955_p2 }
  0x33   : > { %p1961_p3 = pnand %p1959_p10, %p1956_p6 }
  0x35   : > { %1964 = shalt.err (!%p1961_p3)
}
  0x36   : > { %s1965_s19 = scalar_lea.vmem %s2259_s22, 1024  ;;  %p1973_p12 = scmp.lt.s32.totalorder %s2259_s22, %s2259_s22 }
  0x37   : > { %p1966_p5 = scmp.ne.s32.totalorder %s2259_s22, %s1965_s19  ;;  %p1974_p0 = scmp.lt.s32.totalorder %s1965_s19, %s1965_s19 }
  0x39   : > { %p1968_p7 = pnand %p1966_p5, %p2271_p13  ;;  %p1975_p1 = por %p1974_p0, %p1973_p12 }
  0x3b   : > { %p1969_p9 = pneg %p1968_p7 }
  0x3d   : > { %p1976_p2 = pnand %p1975_p1, %p1969_p9 }
  0x3f   : > { %1979 = shalt.err (!%p1976_p2)
}
  0x40   : > { %1765 = dma.hbm_to_vmem [thread:$0]  (!%p2255_p11), %s2748_s5, 1024, %s2259_s22, [#allocation9], %s2759_s25, %s2759_s25, %s2760_s26  }
  0x41   : > { %s1980_s28 = scalar_lea.hbm %s2746_s3, 1024 }
  0x42   : > { %p1981_p6 = scmp.ne.s32.totalorder %s2746_s3, %s1980_s28  ;;  %p1987_p5 = scmp.lt.u32.totalorder %s1980_s28, %s2746_s3 }
  0x44   : > { %p1983_p10 = pnand %p1981_p6, %p2271_p13 }
  0x46   : > { %p1984_p3 = pneg %p1983_p10 }
  0x48   : > { %p1989_p7 = pnand %p1987_p5, %p1984_p3 }
  0x4a   : > { %1992 = shalt.err (!%p1989_p7)
}
  0x4b   : > { %s1993_s19 = scalar_lea.vmem %s281_s24, 1024  ;;  %p2001_p1 = scmp.lt.s32.totalorder %s281_s24, %s281_s24 }
  0x4c   : > { %p1994_p9 = scmp.ne.s32.totalorder %s281_s24, %s1993_s19  ;;  %p2002_p2 = scmp.lt.s32.totalorder %s1993_s19, %s1993_s19 }
  0x4e   : > { %p1996_p12 = pnand %p1994_p9, %p2271_p13  ;;  %p2003_p4 = por %p2002_p2, %p2001_p1 }
  0x50   : > { %p1997_p0 = pneg %p1996_p12 }
  0x52   : > { %p2004_p8 = pnand %p2003_p4, %p1997_p0 }
  0x54   : > { %2007 = shalt.err (!%p2004_p8)
}
  0x55   : > { %1762 = dma.hbm_to_vmem [thread:$0]  (!%p2255_p11), %s2746_s3, 1024, %s281_s24, [#allocation6], %s2759_s25, %s2759_s25, %s2760_s26  }
  0x56   : > { %s2147_s30 = smov [#allocation10]   ;;  %s2008_s29 = scalar_lea.hbm %s2750_s7, 1024 }
  0x57   : > { %s312_s16 = sshll.u32 %s2147_s30, 4  ;;  %p2009_p4 = scmp.ne.s32.totalorder %s2750_s7, %s2008_s29  ;;  %s313_s16 = int_to_ptr.vmem [resolvable:$true] %s312_s16 }
  0x58   : > { %p2015_p10 = scmp.lt.u32.totalorder %s2008_s29, %s2750_s7 }
  0x59   : > { %p2011_p8 = pnand %p2009_p4, %p2271_p13 }
  0x5b   : > { %p2012_p6 = pneg %p2011_p8 }
  0x5d   : > { %p2017_p3 = pnand %p2015_p10, %p2012_p6 }
  0x5f   : > { %2020 = shalt.err (!%p2017_p3)
}
  0x60   : > { %s2021_s24 = scalar_lea.vmem %s313_s16, 1024  ;;  %p2029_p12 = scmp.lt.s32.totalorder %s313_s16, %s313_s16 }
  0x61   : > { %p2022_p5 = scmp.ne.s32.totalorder %s313_s16, %s2021_s24  ;;  %p2030_p0 = scmp.lt.s32.totalorder %s2021_s24, %s2021_s24 }
  0x63   : > { %p2024_p7 = pnand %p2022_p5, %p2271_p13  ;;  %p2031_p1 = por %p2030_p0, %p2029_p12 }
  0x65   : > { %p2025_p9 = pneg %p2024_p7 }
  0x67   : > { %p2032_p2 = pnand %p2031_p1, %p2025_p9 }
  0x69   : > { %2035 = shalt.err (!%p2032_p2)
}
  0x6a   : > { %1768 = dma.hbm_to_vmem [thread:$0]  (!%p2255_p11), %s2750_s7, 1024, %s313_s16, [#allocation9], %s2759_s25, %s2759_s25, %s2760_s26  }
  0x6b   : > { %s2365_s14 = sadd.s32 1, %s2140_s12   ;;  %s34_s20 = sadd.s32 1, %s2136_s11 }
  0x6c   : > { %s31_s30 = ssub.s32 %s2140_s12, %s2365_s14  ;;  %p41_p13 = scmp.ne.s32.totalorder %s2136_s11, %s2132_s10 }
  0x6d   : > { %p32_p4 = scmp.eq.s32.totalorder %s31_s30, 0  ;;  %p42_p8 = scmp.eq.s32.totalorder %s2140_s12, 0 }
  0x6e   : > { %p2769_p6 = scmp.eq.s32.totalorder %s2225_s13, 1  ;;  %p1781_p3 = scmp.lt.s32.totalorder %s2140_s12, 2 }
  0x6f   : > { %s2381_s28 = scalar_select %p32_p4, %s2136_s11, %s34_s20  }
  0x70   : > { %p2375_p10 = por %p2769_p6, %p41_p13  ;;  %p43_p5 = por %p42_p8, %p41_p13 }
  0x71   : > { %s329_s29 = sand.u32 1, %s2136_s11   ;;  %s1495_s16 = smul.u32 896, %s2140_s12 }
  0x72   : > { %s1733_s18 = smul.u32 56, %s329_s29  ;;  %p2385_p11 = pnand %p1781_p3, %p43_p5 }
  0x73   : > { %s2392_s24 = scalar_lea.hbm %s2743_s0, %s1495_s16  ;;  %s2396_s20 = scalar_lea.sflag [#allocation3], %s329_s29 }
  0x74   : > { %s333_s22 = scalar_lea.vmem [#allocation2], %s1733_s18  ;;  %s2036_s30 = scalar_lea.hbm %s2392_s24, 896 }
  0x75   : > { %s340_s9 = sshll.u32 %s333_s22, 4  ;;  %p2037_p7 = scmp.ne.s32.totalorder %s2392_s24, %s2036_s30  ;;  %s2394_s9 = int_to_ptr.vmem [resolvable:$true] %s340_s9 }
  0x76   : > { %p2038_p9 = pneg %p2385_p11  ;;  %s2041_s19 = scalar_lea.hbm %s2743_s0, 1792 }
  0x77   : > { %p2042_p1 = scmp.lt.u32.totalorder %s2392_s24, %s2743_s0  ;;  %p2043_p2 = scmp.lt.u32.totalorder %s2041_s19, %s2036_s30 }
  0x78   : > { %p2039_p12 = pnand %p2038_p9, %p2037_p7  ;;  %p2045_p4 = scmp.lt.u32.totalorder %s2036_s30, %s2392_s24 }
  0x79   : > { %p2044_p13 = por %p2043_p2, %p2042_p1 }
  0x7a   : > { %p2040_p0 = pneg %p2039_p12 }
  0x7b   : > { %p2046_p8 = por %p2045_p4, %p2044_p13 }
  0x7d   : > { %p2047_p6 = pnand %p2046_p8, %p2040_p0 }
  0x7f   : > { %2050 = shalt.err (!%p2047_p6)
}
  0x80   : > { %s2051_s29 = scalar_lea.vmem %s2394_s9, 896  ;;  %s2148_s18 = smov [#allocation2]  }
  0x81   : > { %p2052_p3 = scmp.ne.s32.totalorder %s2394_s9, %s2051_s29  ;;  %s2056_s22 = sshll.u32 %s2148_s18, 4  ;;  %s2057_s22 = int_to_ptr.vmem [resolvable:$false] %s2056_s22 }
  0x82   : > { %s2058_s25 = scalar_lea.vmem %s2057_s22, 1792  ;;  %p2059_p12 = scmp.lt.s32.totalorder %s2394_s9, %s2057_s22 }
  0x83   : > { %p2054_p5 = pnand %p2052_p3, %p2038_p9  ;;  %p2060_p1 = scmp.lt.s32.totalorder %s2058_s25, %s2051_s29 }
  0x85   : > { %p2055_p7 = pneg %p2054_p5  ;;  %p2061_p2 = por %p2060_p1, %p2059_p12 }
  0x87   : > { %p2062_p13 = pnand %p2061_p2, %p2055_p7 }
  0x89   : > { %2065 = shalt.err (!%p2062_p13)
}
  0x8a   : > { %s2772_s26 = smov 4   ;;  %s2773_s30 = smov 64  }
  0x8b   : > { %1772 = dma.hbm_to_vmem [thread:$0]  (!%p2385_p11), %s2392_s24, 896, %s2394_s9, %s2396_s20, %s2773_s30, %s2773_s30, %s2772_s26  }
  0x8c   : > { %p2774_p9 = scmp.ne.s32.totalorder %s2766_s17, 0 }
  0x8d   : > { %s2430_s16 = sand.u32 (!%p2774_p9), 1, %s2132_s10   ;;  %p2775_p0 = scmp.ne.s32.totalorder (!%p2774_p9), %s2763_s15, 0 }
  0x8e   : > { %352 = sbr.rel (%p2774_p9) target bundleno = 1164 (0x48c), region = 56  ;;  %s355_s19 = scalar_lea.sflag (!%p2774_p9), [#allocation3], %s2430_s16 }
  0x8f   : > { %s1734_s23 = smul.u32 (!%p2774_p9), 56, %s2430_s16 }
  0x91   : > { %s2434_s29 = scalar_lea.vmem (!%p2774_p9), [#allocation2], %s1734_s23 }
  0x95   : > { %2111 = dma.done.wait (%p2775_p0), %s355_s19, 896  }
  0x96   : > { %2113 = vsyncadd (%p2775_p0), %s355_s19, 4294966400  ;;  %p2776_p11 = scmp.eq.s32.totalorder %s2225_s13, 0 }
  0x98   : > { %2115 = dma.done.wait (%p2776_p11), [#allocation6], 2048   ;;  %p2777_p4 = pmov %p2776_p11 }
  0x9a   : > { %2117 = vsyncadd (%p2777_p4), [#allocation6], 4294965248  ;;  %p2778_p8 = pmov %p2777_p4 }
  0x9b   : > { %p2779_p6 = pmov %p2777_p4 }
  0x9c   : > { %2119 = dma.done.wait (%p2778_p8), [#allocation9], 2048  }
  0x9d   : > { %2121 = vsyncadd (%p2779_p6), [#allocation9], 4294965248  ;;  %v2149_v0 = vmov 0.0   ;;  %vm2150_vm0 = vmmov 0   ;;  %v1829_v1 = vld [vmem:[#allocation5] sm:$0xff]   ;;  %v1830_v2 = vld [vmem:[#allocation5 + $0x8] sm:$0xff]  }
  0x9e   : > { %1557 = vmatprep.subr.bf16.mxu0 %v2149_v0  ;;  %1573 = vmatprep.mubr.msk.bf16.mxu0 %vm2150_vm0, %v2149_v0  ;;  %v1831_v3 = vld [vmem:[#allocation5 + $0x10] sm:$0xff]   ;;  %v1832_v4 = vld [vmem:[#allocation5 + $0x18] sm:$0xff]   ;;  %v1833_v5 = vld [vmem:[#allocation5 + $0x20] sm:$0xff]   ;;  %s1735_s25 = smul.u32 112, %s2430_s16  ;;  %s2780_s15 = sld [smem:[#allocation18_spill]] }
  0x9f   : > { %1601 = vmatprep.subr.bf16.mxu1 %v2149_v0  ;;  %1617 = vmatprep.mubr.msk.bf16.mxu1 %vm2150_vm0, %v2149_v0  ;;  %v1844_v6 = vld [vmem:[#allocation7] sm:$0xff]   ;;  %v1845_v7 = vld [vmem:[#allocation7 + $0x8] sm:$0xff]   ;;  %v1835_v9 = vld [vmem:[#allocation5 + $0x30] sm:$0xff]   ;;  %s1496_s30 = smul.u32 1792, %s2225_s13  ;;  %s1312_s13 = scalar_lea.sflag [#allocation4], %s2430_s16 }
  0xa0   : > { %1558 = vmatpush3.bf16.msra.mxu0 %v1829_v1  ;;  %1602 = vmatpush3.bf16.msra.mxu1 %v1844_v6  ;;  %v1834_v8 = vld [vmem:[#allocation5 + $0x28] sm:$0xff]   ;;  %v1846_v10 = vld [vmem:[#allocation7 + $0x10] sm:$0xff]   ;;  %v1847_v11 = vld [vmem:[#allocation7 + $0x18] sm:$0xff]   ;;  %s2643_s26 = scalar_lea.vmem [#allocation11], %s1735_s25  ;;  %s2151_s24 = smov [#allocation11]  }
  0xa1   : > { %1559 = vmatprep.subr.bf16.mxu0 %v2149_v0  ;;  %1603 = vmatprep.subr.bf16.mxu1 %v2149_v0  ;;  %v1836_v12 = vld [vmem:[#allocation5 + $0x38] sm:$0xff]   ;;  %v1837_v13 = vld [vmem:[%s2434_s29] sm:$0xff]   ;;  %v1848_v14 = vld [vmem:[#allocation7 + $0x20] sm:$0xff]   ;;  %s1325_s23 = sshll.u32 %s2643_s26, 4  ;;  %s2070_s9 = sshll.u32 %s2151_s24, 4  ;;  %s2696_s23 = int_to_ptr.vmem [resolvable:$true] %s1325_s23  ;;  %s2071_s9 = int_to_ptr.vmem [resolvable:$false] %s2070_s9 }
  0xa2   : > { %v1849_v15 = vld [vmem:[#allocation7 + $0x28] sm:$0xff]   ;;  %v1838_v16 = vld [vmem:[%s2434_s29 + $0x8] sm:$0xff]   ;;  %v1839_v17 = vld [vmem:[%s2434_s29 + $0x10] sm:$0xff]   ;;  %s2066_s21 = scalar_lea.vmem %s2696_s23, 1792  ;;  %s2072_s20 = scalar_lea.vmem %s2071_s9, 3584 }
  0xa3   : > { %v1840_v18 = vld [vmem:[%s2434_s29 + $0x18] sm:$0xff]   ;;  %v1841_v19 = vld [vmem:[%s2434_s29 + $0x20] sm:$0xff]   ;;  %v1842_v20 = vld [vmem:[%s2434_s29 + $0x28] sm:$0xff]   ;;  %p2067_p3 = scmp.ne.s32.totalorder %s2696_s23, %s2066_s21  ;;  %p2073_p12 = scmp.lt.s32.totalorder %s2696_s23, %s2071_s9 }
  0xa4   : > { %1560 = vmatpush3.bf16.msra.mxu0 %v1830_v2  ;;  %1604 = vmatpush3.bf16.msra.mxu1 %v1845_v7  ;;  %v1843_v21 = vld [vmem:[%s2434_s29 + $0x30] sm:$0xff]   ;;  %v1850_v22 = vld [vmem:[#allocation7 + $0x30] sm:$0xff]   ;;  %v1853_v25 = vld [vmem:[#allocation8 + $0x8] sm:$0xff]   ;;  %s2694_s17 = scalar_lea.hbm %s2780_s15, %s1496_s30  ;;  %p2074_p1 = scmp.lt.s32.totalorder %s2072_s20, %s2066_s21 }
  0xa5   : > { %1561 = vmatprep.subr.bf16.mxu0 %v2149_v0  ;;  %1605 = vmatprep.subr.bf16.mxu1 %v2149_v0  ;;  %v1851_v23 = vld [vmem:[#allocation7 + $0x38] sm:$0xff]   ;;  %v1852_v24 = vld [vmem:[#allocation8] sm:$0xff]   ;;  %v1854_v26 = vld [vmem:[#allocation8 + $0x10] sm:$0xff]   ;;  %p2068_p5 = pnand %p2067_p3, %p2375_p10 }
  0xa6   : > { %v1855_v27 = vld [vmem:[#allocation8 + $0x18] sm:$0xff]   ;;  %v1856_v28 = vld [vmem:[#allocation8 + $0x20] sm:$0xff]   ;;  %v1857_v29 = vld [vmem:[#allocation8 + $0x28] sm:$0xff]   ;;  %p2075_p2 = por %p2074_p1, %p2073_p12 }
  0xa7   : > { %v1858_v30 = vld [vmem:[#allocation8 + $0x30] sm:$0xff]   ;;  %p2069_p7 = pneg %p2068_p5 }
  0xa8   : > { %1562 = vmatpush3.bf16.msra.mxu0 %v1831_v3  ;;  %1606 = vmatpush3.bf16.msra.mxu1 %v1846_v10  ;;  %v2501_v31 = vld [vmem:[%s2745_s2] ss:$0 sm:$0xff] }
  0xa9   : > { %1563 = vmatprep.subr.bf16.mxu0 %v2149_v0  ;;  %1607 = vmatprep.subr.bf16.mxu1 %v2149_v0  ;;  %p2076_p13 = pnand %p2075_p2, %p2069_p7 }
  0xac   : > { %1564 = vmatpush3.bf16.msra.mxu0 %v1832_v4  ;;  %1608 = vmatpush3.bf16.msra.mxu1 %v1847_v11 }
  0xad   : > { %1565 = vmatprep.subr.bf16.mxu0 %v2149_v0  ;;  %1609 = vmatprep.subr.bf16.mxu1 %v2149_v0 }
  0xb0   : > { %1566 = vmatpush3.bf16.msra.mxu0 %v1833_v5  ;;  %1610 = vmatpush3.bf16.msra.mxu1 %v1848_v14 }
  0xb1   : > { %1567 = vmatprep.subr.bf16.mxu0 %v2149_v0  ;;  %1611 = vmatprep.subr.bf16.mxu1 %v2149_v0 }
  0xb4   : > { %1568 = vmatpush3.bf16.msra.mxu0 %v1834_v8  ;;  %1612 = vmatpush3.bf16.msra.mxu1 %v1849_v15 }
  0xb5   : > { %1569 = vmatprep.subr.bf16.mxu0 %v2149_v0  ;;  %1613 = vmatprep.subr.bf16.mxu1 %v2149_v0 }
  0xb8   : > { %1570 = vmatpush3.bf16.msra.mxu0 %v1835_v9  ;;  %1614 = vmatpush3.bf16.msra.mxu1 %v1850_v22 }
  0xb9   : > { %1571 = vmatprep.subr.bf16.mxu0 %v2149_v0  ;;  %1615 = vmatprep.subr.bf16.mxu1 %v2149_v0 }
  0xbc   : > { %1572 = vmatpush3.bf16.msra.mxu0 %v1836_v12  ;;  %1616 = vmatpush3.bf16.msra.mxu1 %v1851_v23 }
  0xbd   : > { %1645 = vmatprep.subr.bf16.mxu0 %v2149_v0  ;;  %1689 = vmatprep.subr.bf16.mxu1 %v2149_v0 }
  0xbf   : > { %1574 = vmatmul.mubr.bf16.vlgmr.msra.gmra.mrb[0].mxu0 %v1837_v13 }
  0xc0   : > { %1577 = vmatprep.mubr.msk.bf16.mxu0 %vm2150_vm0, %v2149_v0  ;;  %1646 = vmatpush3.bf16.msra.mxu0 %v1852_v24 }
  0xc1   : > { %1647 = vmatprep.subr.bf16.mxu0 %v2149_v0 }
  0xc4   : > { %1648 = vmatpush3.bf16.msra.mxu0 %v1853_v25 }
  0xc5   : > { %1649 = vmatprep.subr.bf16.mxu0 %v2149_v0 }
  0xc7   : > { %1578 = vmatmul.mubr.bf16.gmra.mrb[4].mxu0 %v1838_v16 }
  0xc8   : > { %1581 = vmatprep.mubr.msk.bf16.mxu0 %vm2150_vm0, %v2149_v0  ;;  %1650 = vmatpush3.bf16.msra.mxu0 %v1854_v26 }
  0xc9   : > { %1651 = vmatprep.subr.bf16.mxu0 %v2149_v0 }
  0xcc   : > { %1652 = vmatpush3.bf16.msra.mxu0 %v1855_v27 }
  0xcd   : > { %1653 = vmatprep.subr.bf16.mxu0 %v2149_v0 }
  0xcf   : > { %1582 = vmatmul.mubr.bf16.gmra.mrb[8].mxu0 %v1839_v17 }
  0xd0   : > { %1585 = vmatprep.mubr.msk.bf16.mxu0 %vm2150_vm0, %v2149_v0  ;;  %1654 = vmatpush3.bf16.msra.mxu0 %v1856_v28 }
  0xd1   : > { %1655 = vmatprep.subr.bf16.mxu0 %v2149_v0 }
  0xd4   : > { %1656 = vmatpush3.bf16.msra.mxu0 %v1857_v29 }
  0xd5   : > { %1657 = vmatprep.subr.bf16.mxu0 %v2149_v0 }
  0xd7   : > { %1586 = vmatmul.mubr.bf16.gmra.mrb[12].mxu0 %v1840_v18 }
  0xd8   : > { %1589 = vmatprep.mubr.msk.bf16.mxu0 %vm2150_vm0, %v2149_v0  ;;  %1658 = vmatpush3.bf16.msra.mxu0 %v1858_v30 }
  0xd9   : > { %1659 = vmatprep.subr.bf16.mxu0 %v2149_v0 }
  0xdf   : > { %1590 = vmatmul.mubr.bf16.gmra.mrb[16].mxu0 %v1841_v19 }
  0xe0   : > { %1593 = vmatprep.mubr.msk.bf16.mxu0 %vm2150_vm0, %v2149_v0 }
  0xe7   : > { %1594 = vmatmul.mubr.bf16.gmra.mrb[20].mxu0 %v1842_v20 }
  0xe8   : > { %1597 = vmatprep.mubr.msk.bf16.mxu0 %vm2150_vm0, %v2149_v0 }
  0xef   : > { %1598 = vmatmul.mubr.bf16.gmra.mrb[24].mxu0 %v1843_v21 }
  0xf0   : > { %1661 = vmatprep.mubr.msk.bf16.mxu0 %vm2150_vm0, %v2149_v0 }
 0x192   : > { %v573_v32 = vpop.f32.mrb[0].mxu0 }
 0x193   : > { %v574_v33 = vadd.f32 %v2501_v31, %v573_v32  ;;  %v1575_v34 = vpop.f32.mrb[1].mxu0 }
 0x194   : > { %v576_v35 = vpop.f32.mrb[2].mxu0  ;;  %v1860_v34 = vld [vmem:[#allocation10] sm:$0xff]  }
 0x195   : > { %v577_v36 = vadd.f32 %v2501_v31, %v576_v35  ;;  %v1576_v37 = vpop.f32.mrb[3].mxu0  ;;  %v628_v38 = vmax.f32 %v574_v33, 0.0  ;;  %v1859_v33 = vld [vmem:[#allocation8 + $0x38] sm:$0xff]   ;;  %v1861_v35 = vld [vmem:[#allocation10 + $0x8] sm:$0xff]  }
 0x196   : > { %1660 = vmatpush3.bf16.msra.mxu0 %v1859_v33  ;;  %v1864_v37 = vld [vmem:[#allocation10 + $0x20] sm:$0xff]  }
 0x197   : > { %v629_v39 = vmax.f32 %v577_v36, 0.0  ;;  %v1862_v36 = vld [vmem:[#allocation10 + $0x10] sm:$0xff]  }
 0x199   : > { %v642_v40 = vpack.c.bf16 %v629_v39, %v628_v38  ;;  %v1865_v38 = vld [vmem:[#allocation10 + $0x28] sm:$0xff]   ;;  %v1866_v39 = vld [vmem:[#allocation10 + $0x30] sm:$0xff]  }
 0x19a   : > { %v581_v41 = vpop.f32.mrb[4].mxu0 }
 0x19b   : > { %v582_v42 = vadd.f32 %v2501_v31, %v581_v41  ;;  %v1579_v43 = vpop.f32.mrb[5].mxu0  ;;  %1618 = vmatmul.mubr.bf16.vlgmr.msra.gmra.mrb[0].mxu1 %v642_v40  ;;  %v2541_v40 = vld [vmem:[%s2747_s4] ss:$0 sm:$0xff] }
 0x19c   : > { %v584_v44 = vpop.f32.mrb[6].mxu0  ;;  %1621 = vmatprep.mubr.msk.bf16.mxu1 %vm2150_vm0, %v2149_v0  ;;  %1690 = vmatpush3.bf16.msra.mxu1 %v1860_v34 }
 0x19d   : > { %v585_v45 = vadd.f32 %v2501_v31, %v584_v44  ;;  %v1580_v46 = vpop.f32.mrb[7].mxu0  ;;  %v630_v47 = vmax.f32 %v582_v42, 0.0  ;;  %1691 = vmatprep.subr.bf16.mxu1 %v2149_v0 }
 0x19f   : > { %v631_v48 = vmax.f32 %v585_v45, 0.0 }
 0x1a0   : > { %1692 = vmatpush3.bf16.msra.mxu1 %v1861_v35 }
 0x1a1   : > { %v643_v49 = vpack.c.bf16 %v631_v48, %v630_v47  ;;  %1693 = vmatprep.subr.bf16.mxu1 %v2149_v0 }
 0x1a2   : > { %v589_v50 = vpop.f32.mrb[8].mxu0 }
 0x1a3   : > { %v590_v51 = vadd.f32 %v2501_v31, %v589_v50  ;;  %v1583_v52 = vpop.f32.mrb[9].mxu0  ;;  %1622 = vmatmul.mubr.bf16.gmra.mrb[4].mxu1 %v643_v49 }
 0x1a4   : > { %v592_v53 = vpop.f32.mrb[10].mxu0  ;;  %1625 = vmatprep.mubr.msk.bf16.mxu1 %vm2150_vm0, %v2149_v0  ;;  %1694 = vmatpush3.bf16.msra.mxu1 %v1862_v36 }
 0x1a5   : > { %v593_v54 = vadd.f32 %v2501_v31, %v592_v53  ;;  %v1584_v55 = vpop.f32.mrb[11].mxu0  ;;  %v632_v56 = vmax.f32 %v590_v51, 0.0  ;;  %1695 = vmatprep.subr.bf16.mxu1 %v2149_v0 }
 0x1a7   : > { %v633_v57 = vmax.f32 %v593_v54, 0.0 }
 0x1a9   : > { %v644_v58 = vpack.c.bf16 %v633_v57, %v632_v56 }
 0x1aa   : > { %v597_v59 = vpop.f32.mrb[12].mxu0 }
 0x1ab   : > { %v598_v60 = vadd.f32 %v2501_v31, %v597_v59  ;;  %v1587_v61 = vpop.f32.mrb[13].mxu0  ;;  %1626 = vmatmul.mubr.bf16.gmra.mrb[8].mxu1 %v644_v58 }
 0x1ac   : > { %v600_v62 = vpop.f32.mrb[14].mxu0  ;;  %1629 = vmatprep.mubr.msk.bf16.mxu1 %vm2150_vm0, %v2149_v0 }
 0x1ad   : > { %v601_v63 = vadd.f32 %v2501_v31, %v600_v62  ;;  %v1588_v1 = vpop.f32.mrb[15].mxu0  ;;  %v634_v2 = vmax.f32 %v598_v60, 0.0 }
 0x1af   : > { %v635_v3 = vmax.f32 %v601_v63, 0.0 }
 0x1b1   : > { %v645_v4 = vpack.c.bf16 %v635_v3, %v634_v2 }
 0x1b2   : > { %v605_v5 = vpop.f32.mrb[16].mxu0 }
 0x1b3   : > { %v606_v6 = vadd.f32 %v2501_v31, %v605_v5  ;;  %v1591_v7 = vpop.f32.mrb[17].mxu0  ;;  %1630 = vmatmul.mubr.bf16.gmra.mrb[12].mxu1 %v645_v4 }
 0x1b4   : > { %v608_v8 = vpop.f32.mrb[18].mxu0  ;;  %1633 = vmatprep.mubr.msk.bf16.mxu1 %vm2150_vm0, %v2149_v0 }
 0x1b5   : > { %v609_v9 = vadd.f32 %v2501_v31, %v608_v8  ;;  %v1592_v10 = vpop.f32.mrb[19].mxu0  ;;  %v636_v11 = vmax.f32 %v606_v6, 0.0 }
 0x1b7   : > { %v637_v12 = vmax.f32 %v609_v9, 0.0 }
 0x1b9   : > { %v646_v13 = vpack.c.bf16 %v637_v12, %v636_v11 }
 0x1ba   : > { %v613_v14 = vpop.f32.mrb[20].mxu0 }
 0x1bb   : > { %v614_v15 = vadd.f32 %v2501_v31, %v613_v14  ;;  %v1595_v16 = vpop.f32.mrb[21].mxu0  ;;  %1634 = vmatmul.mubr.bf16.gmra.mrb[16].mxu1 %v646_v13 }
 0x1bc   : > { %v616_v17 = vpop.f32.mrb[22].mxu0  ;;  %1637 = vmatprep.mubr.msk.bf16.mxu1 %vm2150_vm0, %v2149_v0 }
 0x1bd   : > { %v617_v18 = vadd.f32 %v2501_v31, %v616_v17  ;;  %v1596_v19 = vpop.f32.mrb[23].mxu0  ;;  %v638_v20 = vmax.f32 %v614_v15, 0.0 }
 0x1bf   : > { %v639_v21 = vmax.f32 %v617_v18, 0.0 }
 0x1c1   : > { %v647_v22 = vpack.c.bf16 %v639_v21, %v638_v20 }
 0x1c2   : > { %v621_v23 = vpop.f32.mrb[24].mxu0 }
 0x1c3   : > { %v622_v24 = vadd.f32 %v2501_v31, %v621_v23  ;;  %v1599_v25 = vpop.f32.mrb[25].mxu0  ;;  %1638 = vmatmul.mubr.bf16.gmra.mrb[20].mxu1 %v647_v22 }
 0x1c4   : > { %v624_v26 = vpop.f32.mrb[26].mxu0  ;;  %1641 = vmatprep.mubr.msk.bf16.mxu1 %vm2150_vm0, %v2149_v0 }
 0x1c5   : > { %v625_v27 = vadd.f32 %v2501_v31, %v624_v26  ;;  %v1600_v28 = vpop.f32.mrb[27].mxu0  ;;  %v640_v29 = vmax.f32 %v622_v24, 0.0  ;;  %v1863_v31 = vld [vmem:[#allocation10 + $0x18] sm:$0xff]  }
 0x1c6   : > { %1696 = vmatpush3.bf16.msra.mxu1 %v1863_v31 }
 0x1c7   : > { %v641_v30 = vmax.f32 %v625_v27, 0.0  ;;  %1697 = vmatprep.subr.bf16.mxu1 %v2149_v0 }
 0x1c9   : > { %v648_v32 = vpack.c.bf16 %v641_v30, %v640_v29 }
 0x1ca   : > { %1698 = vmatpush3.bf16.msra.mxu1 %v1864_v37 }
 0x1cb   : > { %1642 = vmatmul.mubr.bf16.gmra.mrb[24].mxu1 %v648_v32  ;;  %1699 = vmatprep.subr.bf16.mxu1 %v2149_v0 }
 0x1cc   : > { %1705 = vmatprep.mubr.msk.bf16.mxu1 %vm2150_vm0, %v2149_v0 }
 0x1ce   : > { %1700 = vmatpush3.bf16.msra.mxu1 %v1865_v38 }
 0x1cf   : > { %1701 = vmatprep.subr.bf16.mxu1 %v2149_v0 }
 0x1d2   : > { %1702 = vmatpush3.bf16.msra.mxu1 %v1866_v39 }
 0x1d3   : > { %1703 = vmatprep.subr.bf16.mxu1 %v2149_v0 }
 0x26e   : > { %v754_v41 = vpop.f32.mrb[0].mxu1 }
 0x26f   : > { %v755_v42 = vadd.f32 %v2541_v40, %v754_v41  ;;  %v1619_v43 = vpop.f32.mrb[1].mxu1 }
 0x270   : > { %v757_v44 = vpop.f32.mrb[2].mxu1  ;;  %v2572_v43 = vld [vmem:[%s2749_s6] ss:$0 sm:$0xff] }
 0x271   : > { %v758_v45 = vadd.f32 %v2541_v40, %v757_v44  ;;  %v1620_v46 = vpop.f32.mrb[3].mxu1  ;;  %v809_v47 = vmax.f32 %v755_v42, 0.0  ;;  %v1867_v42 = vld [vmem:[#allocation10 + $0x38] sm:$0xff]  }
 0x272   : > { %1704 = vmatpush3.bf16.msra.mxu1 %v1867_v42 }
 0x273   : > { %v810_v48 = vmax.f32 %v758_v45, 0.0 }
 0x275   : > { %v823_v49 = vpack.c.bf16 %v810_v48, %v809_v47 }
 0x276   : > { %v762_v50 = vpop.f32.mrb[4].mxu1 }
 0x277   : > { %v763_v51 = vadd.f32 %v2541_v40, %v762_v50  ;;  %v1623_v52 = vpop.f32.mrb[5].mxu1  ;;  %1662 = vmatmul.mubr.bf16.vlgmr.msra.gmra.mrb[28].mxu0 %v823_v49 }
 0x278   : > { %v765_v53 = vpop.f32.mrb[6].mxu1  ;;  %1665 = vmatprep.mubr.msk.bf16.mxu0 %vm2150_vm0, %v2149_v0 }
 0x279   : > { %v766_v54 = vadd.f32 %v2541_v40, %v765_v53  ;;  %v1624_v55 = vpop.f32.mrb[7].mxu1  ;;  %v811_v56 = vmax.f32 %v763_v51, 0.0 }
 0x27b   : > { %v812_v57 = vmax.f32 %v766_v54, 0.0 }
 0x27d   : > { %v824_v58 = vpack.c.bf16 %v812_v57, %v811_v56 }
 0x27e   : > { %v770_v59 = vpop.f32.mrb[8].mxu1 }
 0x27f   : > { %v771_v60 = vadd.f32 %v2541_v40, %v770_v59  ;;  %v1627_v61 = vpop.f32.mrb[9].mxu1  ;;  %1666 = vmatmul.mubr.bf16.gmra.mrb[32].mxu0 %v824_v58 }
 0x280   : > { %v773_v62 = vpop.f32.mrb[10].mxu1  ;;  %1669 = vmatprep.mubr.msk.bf16.mxu0 %vm2150_vm0, %v2149_v0 }
 0x281   : > { %v774_v63 = vadd.f32 %v2541_v40, %v773_v62  ;;  %v1628_v1 = vpop.f32.mrb[11].mxu1  ;;  %v813_v2 = vmax.f32 %v771_v60, 0.0 }
 0x283   : > { %v814_v3 = vmax.f32 %v774_v63, 0.0 }
 0x285   : > { %v825_v4 = vpack.c.bf16 %v814_v3, %v813_v2 }
 0x286   : > { %v778_v5 = vpop.f32.mrb[12].mxu1 }
 0x287   : > { %v779_v6 = vadd.f32 %v2541_v40, %v778_v5  ;;  %v1631_v7 = vpop.f32.mrb[13].mxu1  ;;  %1670 = vmatmul.mubr.bf16.gmra.mrb[36].mxu0 %v825_v4 }
 0x288   : > { %v781_v8 = vpop.f32.mrb[14].mxu1  ;;  %1673 = vmatprep.mubr.msk.bf16.mxu0 %vm2150_vm0, %v2149_v0 }
 0x289   : > { %v782_v9 = vadd.f32 %v2541_v40, %v781_v8  ;;  %v1632_v10 = vpop.f32.mrb[15].mxu1  ;;  %v815_v11 = vmax.f32 %v779_v6, 0.0 }
 0x28b   : > { %v816_v12 = vmax.f32 %v782_v9, 0.0 }
 0x28d   : > { %v826_v13 = vpack.c.bf16 %v816_v12, %v815_v11 }
 0x28e   : > { %v786_v14 = vpop.f32.mrb[16].mxu1 }
 0x28f   : > { %v787_v15 = vadd.f32 %v2541_v40, %v786_v14  ;;  %v1635_v16 = vpop.f32.mrb[17].mxu1  ;;  %1674 = vmatmul.mubr.bf16.gmra.mrb[40].mxu0 %v826_v13 }
 0x290   : > { %v789_v17 = vpop.f32.mrb[18].mxu1  ;;  %1677 = vmatprep.mubr.msk.bf16.mxu0 %vm2150_vm0, %v2149_v0 }
 0x291   : > { %v790_v18 = vadd.f32 %v2541_v40, %v789_v17  ;;  %v1636_v19 = vpop.f32.mrb[19].mxu1  ;;  %v817_v20 = vmax.f32 %v787_v15, 0.0 }
 0x293   : > { %v818_v21 = vmax.f32 %v790_v18, 0.0 }
 0x295   : > { %v827_v22 = vpack.c.bf16 %v818_v21, %v817_v20 }
 0x296   : > { %v794_v23 = vpop.f32.mrb[20].mxu1 }
 0x297   : > { %v795_v24 = vadd.f32 %v2541_v40, %v794_v23  ;;  %v1639_v25 = vpop.f32.mrb[21].mxu1  ;;  %1678 = vmatmul.mubr.bf16.gmra.mrb[44].mxu0 %v827_v22 }
 0x298   : > { %v797_v26 = vpop.f32.mrb[22].mxu1  ;;  %1681 = vmatprep.mubr.msk.bf16.mxu0 %vm2150_vm0, %v2149_v0 }
 0x299   : > { %v798_v27 = vadd.f32 %v2541_v40, %v797_v26  ;;  %v1640_v28 = vpop.f32.mrb[23].mxu1  ;;  %v819_v29 = vmax.f32 %v795_v24, 0.0 }
 0x29b   : > { %v820_v30 = vmax.f32 %v798_v27, 0.0 }
 0x29d   : > { %v828_v32 = vpack.c.bf16 %v820_v30, %v819_v29 }
 0x29e   : > { %v802_v33 = vpop.f32.mrb[24].mxu1 }
 0x29f   : > { %v803_v34 = vadd.f32 %v2541_v40, %v802_v33  ;;  %v1643_v35 = vpop.f32.mrb[25].mxu1  ;;  %1682 = vmatmul.mubr.bf16.gmra.mrb[48].mxu0 %v828_v32 }
 0x2a0   : > { %v805_v36 = vpop.f32.mrb[26].mxu1  ;;  %1685 = vmatprep.mubr.msk.bf16.mxu0 %vm2150_vm0, %v2149_v0 }
 0x2a1   : > { %v806_v31 = vadd.f32 %v2541_v40, %v805_v36  ;;  %v1644_v37 = vpop.f32.mrb[27].mxu1  ;;  %v821_v38 = vmax.f32 %v803_v34, 0.0 }
 0x2a3   : > { %v822_v39 = vmax.f32 %v806_v31, 0.0 }
 0x2a5   : > { %v829_v41 = vpack.c.bf16 %v822_v39, %v821_v38 }
 0x2a7   : > { %1686 = vmatmul.mubr.bf16.gmra.mrb[52].mxu0 %v829_v41 }
 0x34a   : > { %v935_v44 = vpop.f32.mrb[28].mxu0 }
 0x34b   : > { %v936_v45 = vadd.f32 %v2572_v43, %v935_v44  ;;  %v1663_v46 = vpop.f32.mrb[29].mxu0 }
 0x34c   : > { %v938_v47 = vpop.f32.mrb[30].mxu0 }
 0x34d   : > { %v939_v48 = vadd.f32 %v2572_v43, %v938_v47  ;;  %v1664_v40 = vpop.f32.mrb[31].mxu0  ;;  %v990_v49 = vmax.f32 %v936_v45, 0.0  ;;  %v2603_v45 = vld [vmem:[%s2751_s8] ss:$0 sm:$0xff] }
 0x34f   : > { %v991_v50 = vmax.f32 %v939_v48, 0.0 }
 0x351   : > { %v1004_v51 = vpack.c.bf16 %v991_v50, %v990_v49 }
 0x352   : > { %v943_v52 = vpop.f32.mrb[32].mxu0 }
 0x353   : > { %v944_v53 = vadd.f32 %v2572_v43, %v943_v52  ;;  %v1667_v54 = vpop.f32.mrb[33].mxu0  ;;  %1706 = vmatmul.mubr.bf16.vlgmr.msra.gmra.mrb[28].mxu1 %v1004_v51 }
 0x354   : > { %v946_v55 = vpop.f32.mrb[34].mxu0  ;;  %1709 = vmatprep.mubr.msk.bf16.mxu1 %vm2150_vm0, %v2149_v0 }
 0x355   : > { %v947_v56 = vadd.f32 %v2572_v43, %v946_v55  ;;  %v1668_v57 = vpop.f32.mrb[35].mxu0  ;;  %v992_v58 = vmax.f32 %v944_v53, 0.0 }
 0x357   : > { %v993_v59 = vmax.f32 %v947_v56, 0.0 }
 0x359   : > { %v1005_v60 = vpack.c.bf16 %v993_v59, %v992_v58 }
 0x35a   : > { %v951_v61 = vpop.f32.mrb[36].mxu0 }
 0x35b   : > { %v952_v62 = vadd.f32 %v2572_v43, %v951_v61  ;;  %v1671_v63 = vpop.f32.mrb[37].mxu0  ;;  %1710 = vmatmul.mubr.bf16.gmra.mrb[32].mxu1 %v1005_v60 }
 0x35c   : > { %v954_v1 = vpop.f32.mrb[38].mxu0  ;;  %1713 = vmatprep.mubr.msk.bf16.mxu1 %vm2150_vm0, %v2149_v0 }
 0x35d   : > { %v955_v2 = vadd.f32 %v2572_v43, %v954_v1  ;;  %v1672_v3 = vpop.f32.mrb[39].mxu0  ;;  %v994_v4 = vmax.f32 %v952_v62, 0.0 }
 0x35f   : > { %v995_v5 = vmax.f32 %v955_v2, 0.0 }
 0x361   : > { %v1006_v6 = vpack.c.bf16 %v995_v5, %v994_v4 }
 0x362   : > { %v959_v7 = vpop.f32.mrb[40].mxu0 }
 0x363   : > { %v960_v8 = vadd.f32 %v2572_v43, %v959_v7  ;;  %v1675_v9 = vpop.f32.mrb[41].mxu0  ;;  %1714 = vmatmul.mubr.bf16.gmra.mrb[36].mxu1 %v1006_v6 }
 0x364   : > { %v962_v10 = vpop.f32.mrb[42].mxu0  ;;  %1717 = vmatprep.mubr.msk.bf16.mxu1 %vm2150_vm0, %v2149_v0 }
 0x365   : > { %v963_v11 = vadd.f32 %v2572_v43, %v962_v10  ;;  %v1676_v12 = vpop.f32.mrb[43].mxu0  ;;  %v996_v13 = vmax.f32 %v960_v8, 0.0 }
 0x367   : > { %v997_v14 = vmax.f32 %v963_v11, 0.0 }
 0x369   : > { %v1007_v15 = vpack.c.bf16 %v997_v14, %v996_v13 }
 0x36a   : > { %v967_v16 = vpop.f32.mrb[44].mxu0 }
 0x36b   : > { %v968_v17 = vadd.f32 %v2572_v43, %v967_v16  ;;  %v1679_v18 = vpop.f32.mrb[45].mxu0  ;;  %1718 = vmatmul.mubr.bf16.gmra.mrb[40].mxu1 %v1007_v15 }
 0x36c   : > { %v970_v19 = vpop.f32.mrb[46].mxu0  ;;  %1721 = vmatprep.mubr.msk.bf16.mxu1 %vm2150_vm0, %v2149_v0 }
 0x36d   : > { %v971_v20 = vadd.f32 %v2572_v43, %v970_v19  ;;  %v1680_v21 = vpop.f32.mrb[47].mxu0  ;;  %v998_v22 = vmax.f32 %v968_v17, 0.0 }
 0x36f   : > { %v999_v23 = vmax.f32 %v971_v20, 0.0 }
 0x371   : > { %v1008_v24 = vpack.c.bf16 %v999_v23, %v998_v22 }
 0x372   : > { %v975_v25 = vpop.f32.mrb[48].mxu0 }
 0x373   : > { %v976_v26 = vadd.f32 %v2572_v43, %v975_v25  ;;  %v1683_v27 = vpop.f32.mrb[49].mxu0  ;;  %1722 = vmatmul.mubr.bf16.gmra.mrb[44].mxu1 %v1008_v24 }
 0x374   : > { %v978_v28 = vpop.f32.mrb[50].mxu0  ;;  %1725 = vmatprep.mubr.msk.bf16.mxu1 %vm2150_vm0, %v2149_v0 }
 0x375   : > { %v979_v29 = vadd.f32 %v2572_v43, %v978_v28  ;;  %v1684_v30 = vpop.f32.mrb[51].mxu0  ;;  %v1000_v32 = vmax.f32 %v976_v26, 0.0 }
 0x377   : > { %v1001_v33 = vmax.f32 %v979_v29, 0.0 }
 0x379   : > { %v1009_v34 = vpack.c.bf16 %v1001_v33, %v1000_v32 }
 0x37a   : > { %v983_v35 = vpop.f32.mrb[52].mxu0 }
 0x37b   : > { %v984_v36 = vadd.f32 %v2572_v43, %v983_v35  ;;  %v1687_v31 = vpop.f32.mrb[53].mxu0  ;;  %1726 = vmatmul.mubr.bf16.gmra.mrb[48].mxu1 %v1009_v34 }
 0x37c   : > { %v986_v37 = vpop.f32.mrb[54].mxu0  ;;  %1729 = vmatprep.mubr.msk.bf16.mxu1 %vm2150_vm0, %v2149_v0 }
 0x37d   : > { %v987_v38 = vadd.f32 %v2572_v43, %v986_v37  ;;  %v1688_v39 = vpop.f32.mrb[55].mxu0  ;;  %v1002_v41 = vmax.f32 %v984_v36, 0.0 }
 0x37f   : > { %v1003_v42 = vmax.f32 %v987_v38, 0.0 }
 0x381   : > { %v1010_v44 = vpack.c.bf16 %v1003_v42, %v1002_v41 }
 0x383   : > { %1730 = vmatmul.mubr.bf16.gmra.mrb[52].mxu1 %v1010_v44 }
 0x426   : > { %v1116_v46 = vpop.f32.mrb[28].mxu1 }
 0x427   : > { %v2606_v47 = vadd.f32 %v2603_v45, %v1116_v46  ;;  %v1707_v48 = vpop.f32.mrb[29].mxu1 }
 0x428   : > { %v1119_v40 = vpop.f32.mrb[30].mxu1 }
 0x429   : > { %v1171_v0 = vand.u32 2147483647, %v2606_v47  ;;  %v2610_v43 = vadd.f32 %v2603_v45, %v1119_v40  ;;  %v1708_v49 = vpop.f32.mrb[31].mxu1  ;;  %vm1255_vm1 = vcmp.ge.f32.partialorder %v2606_v47, 0.0 }
 0x42b   : > { %v1185_v50 = vsub.f32 0.0, %v1171_v0  ;;  %v1172_v51 = vand.u32 2147483647, %v2610_v43  ;;  %vm1256_vm2 = vcmp.ge.f32.partialorder %v2610_v43, 0.0 }
 0x42d   : > { %v1199_v52 = vmul.f32 1.442695, %v1185_v50  ;;  %v1186_v53 = vsub.f32 0.0, %v1172_v51 }
 0x42e   : > { %v1124_v54 = vpop.f32.mrb[32].mxu1 }
 0x42f   : > { %1868 = vpow2.f32 %v1199_v52  ;;  %v1201_v55 = vmul.f32 1.442695, %v1186_v53  ;;  %v2614_v56 = vadd.f32 %v2603_v45, %v1124_v54  ;;  %v1711_v57 = vpop.f32.mrb[33].mxu1 }
 0x430   : > { %v1127_v58 = vpop.f32.mrb[34].mxu1 }
 0x431   : > { %1870 = vpow2.f32 %v1201_v55  ;;  %v1173_v59 = vand.u32 2147483647, %v2614_v56  ;;  %v2618_v60 = vadd.f32 %v2603_v45, %v1127_v58  ;;  %v1712_v61 = vpop.f32.mrb[35].mxu1  ;;  %vm1257_vm3 = vcmp.ge.f32.partialorder %v2614_v56, 0.0 }
 0x433   : > { %v1187_v62 = vsub.f32 0.0, %v1173_v59  ;;  %v1174_v63 = vand.u32 2147483647, %v2618_v60  ;;  %vm1258_vm4 = vcmp.ge.f32.partialorder %v2618_v60, 0.0 }
 0x435   : > { %v1203_v1 = vmul.f32 1.442695, %v1187_v62  ;;  %v1188_v2 = vsub.f32 0.0, %v1174_v63 }
 0x436   : > { %v1132_v3 = vpop.f32.mrb[36].mxu1 }
 0x437   : > { %1872 = vpow2.f32 %v1203_v1  ;;  %v1205_v4 = vmul.f32 1.442695, %v1188_v2  ;;  %v2622_v5 = vadd.f32 %v2603_v45, %v1132_v3  ;;  %v1715_v6 = vpop.f32.mrb[37].mxu1 }
 0x438   : > { %v1135_v7 = vpop.f32.mrb[38].mxu1 }
 0x439   : > { %v1869_v8 = vpop.eup %1868  ;;  %1874 = vpow2.f32 %v1205_v4  ;;  %v1175_v9 = vand.u32 2147483647, %v2622_v5  ;;  %v2626_v10 = vadd.f32 %v2603_v45, %v1135_v7  ;;  %v1716_v11 = vpop.f32.mrb[39].mxu1  ;;  %vm1259_vm5 = vcmp.ge.f32.partialorder %v2622_v5, 0.0 }
 0x43a   : > { %v1227_v12 = vadd.f32 1.0, %v1869_v8 }
 0x43b   : > { %v1871_v13 = vpop.eup %1870  ;;  %v1189_v14 = vsub.f32 0.0, %v1175_v9  ;;  %v1176_v15 = vand.u32 2147483647, %v2626_v10  ;;  %vm1260_vm6 = vcmp.ge.f32.partialorder %v2626_v10, 0.0 }
 0x43c   : > { %1876 = vrcp.f32 %v1227_v12  ;;  %v1228_v16 = vadd.f32 1.0, %v1871_v13 }
 0x43d   : > { %v1207_v17 = vmul.f32 1.442695, %v1189_v14  ;;  %v1190_v18 = vsub.f32 0.0, %v1176_v15 }
 0x43e   : > { %1878 = vrcp.f32 %v1228_v16  ;;  %v1140_v19 = vpop.f32.mrb[40].mxu1 }
 0x43f   : > { %1880 = vpow2.f32 %v1207_v17  ;;  %v1209_v20 = vmul.f32 1.442695, %v1190_v18  ;;  %v2630_v21 = vadd.f32 %v2603_v45, %v1140_v19  ;;  %v1719_v22 = vpop.f32.mrb[41].mxu1 }
 0x440   : > { %v1143_v23 = vpop.f32.mrb[42].mxu1 }
 0x441   : > { %v1873_v24 = vpop.eup %1872  ;;  %1882 = vpow2.f32 %v1209_v20  ;;  %v1177_v25 = vand.u32 2147483647, %v2630_v21  ;;  %v2634_v26 = vadd.f32 %v2603_v45, %v1143_v23  ;;  %v1720_v27 = vpop.f32.mrb[43].mxu1  ;;  %vm1261_vm7 = vcmp.ge.f32.partialorder %v2630_v21, 0.0 }
 0x442   : > { %v1229_v28 = vadd.f32 1.0, %v1873_v24 }
 0x443   : > { %v1875_v29 = vpop.eup %1874  ;;  %v1191_v30 = vsub.f32 0.0, %v1177_v25  ;;  %v1178_v32 = vand.u32 2147483647, %v2634_v26  ;;  %vm1262_vm8 = vcmp.ge.f32.partialorder %v2634_v26, 0.0 }
 0x444   : > { %1884 = vrcp.f32 %v1229_v28  ;;  %v1230_v33 = vadd.f32 1.0, %v1875_v29 }
 0x445   : > { %v1211_v34 = vmul.f32 1.442695, %v1191_v30  ;;  %v1192_v35 = vsub.f32 0.0, %v1178_v32 }
 0x446   : > { %v1877_v36 = vpop.eup %1876  ;;  %1886 = vrcp.f32 %v1230_v33  ;;  %v1148_v31 = vpop.f32.mrb[44].mxu1 }
 0x447   : > { %v1269_v37 = vmul.f32 %v1877_v36, %v1869_v8  ;;  %1888 = vpow2.f32 %v1211_v34  ;;  %v1213_v38 = vmul.f32 1.442695, %v1192_v35  ;;  %v2639_v39 = vadd.f32 %v2603_v45, %v1148_v31  ;;  %v1723_v41 = vpop.f32.mrb[45].mxu1 }
 0x448   : > { %v1879_v42 = vpop.eup %1878  ;;  %v1151_v44 = vpop.f32.mrb[46].mxu1 }
 0x449   : > { %v1881_v46 = vpop.eup %1880  ;;  %v1283_v48 = vsel %vm1255_vm1, %v1877_v36, %v1269_v37  ;;  %v1270_v40 = vmul.f32 %v1879_v42, %v1871_v13  ;;  %1890 = vpow2.f32 %v1213_v38  ;;  %v1179_v0 = vand.u32 2147483647, %v2639_v39  ;;  %v1724_v49 = vpop.f32.mrb[47].mxu1 }
 0x44a   : > { %1297 = vst [vmem:[%s2643_s26] sm:$0xff] %v1283_v48  ;;  %v1231_v50 = vadd.f32 1.0, %v1881_v46  ;;  %v2648_v51 = vadd.f32 %v2603_v45, %v1151_v44  ;;  %vm1263_vm9 = vcmp.ge.f32.partialorder %v2639_v39, 0.0 }
 0x44b   : > { %v1883_v47 = vpop.eup %1882  ;;  %v1284_v52 = vsel %vm1256_vm2, %v1879_v42, %v1270_v40  ;;  %v1193_v53 = vsub.f32 0.0, %v1179_v0 }
 0x44c   : > { %1298 = vst [vmem:[%s2643_s26 + $0x8] sm:$0xff] %v1284_v52  ;;  %1892 = vrcp.f32 %v1231_v50  ;;  %v1232_v54 = vadd.f32 1.0, %v1883_v47  ;;  %v1180_v55 = vand.u32 2147483647, %v2648_v51  ;;  %vm1264_vm10 = vcmp.ge.f32.partialorder %v2648_v51, 0.0 }
 0x44d   : > { %v1215_v57 = vmul.f32 1.442695, %v1193_v53 }
 0x44e   : > { %v1885_v58 = vpop.eup %1884  ;;  %1894 = vrcp.f32 %v1232_v54  ;;  %v1194_v59 = vsub.f32 0.0, %v1180_v55  ;;  %v1156_v61 = vpop.f32.mrb[48].mxu1 }
 0x44f   : > { %v1271_v62 = vmul.f32 %v1885_v58, %v1873_v24  ;;  %1896 = vpow2.f32 %v1215_v57  ;;  %v2653_v43 = vadd.f32 %v2603_v45, %v1156_v61  ;;  %v1727_v63 = vpop.f32.mrb[49].mxu1 }
 0x450   : > { %v1887_v1 = vpop.eup %1886  ;;  %v1217_v2 = vmul.f32 1.442695, %v1194_v59  ;;  %v1159_v3 = vpop.f32.mrb[50].mxu1 }
 0x451   : > { %v1889_v4 = vpop.eup %1888  ;;  %v1285_v6 = vsel %vm1257_vm3, %v1885_v58, %v1271_v62  ;;  %v1272_v7 = vmul.f32 %v1887_v1, %v1875_v29  ;;  %v1181_v8 = vand.u32 2147483647, %v2653_v43  ;;  %v1728_v9 = vpop.f32.mrb[51].mxu1  ;;  %v2660_v12 = vadd.f32 %v2603_v45, %v1159_v3 }
 0x452   : > { %1299 = vst [vmem:[%s2643_s26 + $0x10] sm:$0xff] %v1285_v6  ;;  %v1233_v11 = vadd.f32 1.0, %v1889_v4  ;;  %1898 = vpow2.f32 %v1217_v2  ;;  %vm1265_vm11 = vcmp.ge.f32.partialorder %v2653_v43, 0.0 }
 0x453   : > { %v1891_v13 = vpop.eup %1890  ;;  %v1286_v14 = vsel %vm1258_vm4, %v1887_v1, %v1272_v7  ;;  %v1195_v56 = vsub.f32 0.0, %v1181_v8  ;;  %v1182_v16 = vand.u32 2147483647, %v2660_v12  ;;  %vm1266_vm12 = vcmp.ge.f32.partialorder %v2660_v12, 0.0 }
 0x454   : > { %1300 = vst [vmem:[%s2643_s26 + $0x18] sm:$0xff] %v1286_v14  ;;  %1900 = vrcp.f32 %v1233_v11  ;;  %v1234_v15 = vadd.f32 1.0, %v1891_v13 }
 0x455   : > { %v1219_v17 = vmul.f32 1.442695, %v1195_v56  ;;  %v1196_v19 = vsub.f32 0.0, %v1182_v16 }
 0x456   : > { %v1893_v18 = vpop.eup %1892  ;;  %1902 = vrcp.f32 %v1234_v15  ;;  %v1164_v20 = vpop.f32.mrb[52].mxu1 }
 0x457   : > { %v1273_v60 = vmul.f32 %v1893_v18, %v1881_v46  ;;  %1904 = vpow2.f32 %v1219_v17  ;;  %v2665_v22 = vadd.f32 %v2603_v45, %v1164_v20  ;;  %v1731_v23 = vpop.f32.mrb[53].mxu1  ;;  %v1221_v25 = vmul.f32 1.442695, %v1196_v19 }
 0x458   : > { %v1895_v24 = vpop.eup %1894  ;;  %v1167_v27 = vpop.f32.mrb[54].mxu1 }
 0x459   : > { %v1897_v28 = vpop.eup %1896  ;;  %v1287_v29 = vsel %vm1259_vm5, %v1893_v18, %v1273_v60  ;;  %v1274_v30 = vmul.f32 %v1895_v24, %v1883_v47  ;;  %v1183_v32 = vand.u32 2147483647, %v2665_v22  ;;  %v1732_v33 = vpop.f32.mrb[55].mxu1  ;;  %1906 = vpow2.f32 %v1221_v25 }
 0x45a   : > { %1301 = vst [vmem:[%s2643_s26 + $0x20] sm:$0xff] %v1287_v29  ;;  %v1235_v34 = vadd.f32 1.0, %v1897_v28  ;;  %v2672_v35 = vadd.f32 %v2603_v45, %v1167_v27  ;;  %vm1267_vm13 = vcmp.ge.f32.partialorder %v2665_v22, 0.0 }
 0x45b   : > { %v1288_v36 = vsel %vm1260_vm6, %v1895_v24, %v1274_v30  ;;  %v1197_v31 = vsub.f32 0.0, %v1183_v32 }
 0x45c   : > { %v1899_v5 = vpop.eup %1898  ;;  %1302 = vst [vmem:[%s2643_s26 + $0x28] sm:$0xff] %v1288_v36  ;;  %1908 = vrcp.f32 %v1235_v34  ;;  %v1184_v37 = vand.u32 2147483647, %v2672_v35  ;;  %vm1268_vm14 = vcmp.ge.f32.partialorder %v2672_v35, 0.0 }
 0x45d   : > { %v1236_v38 = vadd.f32 1.0, %v1899_v5  ;;  %v1223_v41 = vmul.f32 1.442695, %v1197_v31 }
 0x45e   : > { %v1901_v42 = vpop.eup %1900  ;;  %v1198_v44 = vsub.f32 0.0, %v1184_v37 }
 0x45f   : > { %v1275_v46 = vmul.f32 %v1901_v42, %v1889_v4  ;;  %1910 = vrcp.f32 %v1236_v38 }
 0x460   : > { %v1903_v10 = vpop.eup %1902  ;;  %1912 = vpow2.f32 %v1223_v41  ;;  %v1225_v45 = vmul.f32 1.442695, %v1198_v44 }
 0x461   : > { %v1905_v48 = vpop.eup %1904  ;;  %v1289_v40 = vsel %vm1261_vm7, %v1901_v42, %v1275_v46  ;;  %v1276_v0 = vmul.f32 %v1903_v10, %v1891_v13 }
 0x462   : > { %1303 = vst [vmem:[%s2643_s26 + $0x30] sm:$0xff] %v1289_v40  ;;  %v1237_v49 = vadd.f32 1.0, %v1905_v48  ;;  %1914 = vpow2.f32 %v1225_v45 }
 0x463   : > { %v1290_v50 = vsel %vm1262_vm8, %v1903_v10, %v1276_v0  ;;  %v1907_v47 = vpop.eup %1906 }
 0x464   : > { %1304 = vst [vmem:[%s2643_s26 + $0x38] sm:$0xff] %v1290_v50  ;;  %1916 = vrcp.f32 %v1237_v49  ;;  %v1238_v52 = vadd.f32 1.0, %v1907_v47 }
 0x466   : > { %v1909_v53 = vpop.eup %1908  ;;  %1918 = vrcp.f32 %v1238_v52 }
 0x467   : > { %v1277_v54 = vmul.f32 %v1909_v53, %v1897_v28 }
 0x469   : > { %v1911_v21 = vpop.eup %1910  ;;  %v1291_v55 = vsel %vm1263_vm9, %v1909_v53, %v1277_v54 }
 0x46a   : > { %v1913_v57 = vpop.eup %1912  ;;  %1305 = vst [vmem:[%s2643_s26 + $0x40] sm:$0xff] %v1291_v55  ;;  %v1278_v58 = vmul.f32 %v1911_v21, %v1899_v5 }
 0x46b   : > { %v1239_v26 = vadd.f32 1.0, %v1913_v57 }
 0x46c   : > { %v1915_v59 = vpop.eup %1914  ;;  %v1292_v61 = vsel %vm1264_vm10, %v1911_v21, %v1278_v58 }
 0x46d   : > { %1306 = vst [vmem:[%s2643_s26 + $0x48] sm:$0xff] %v1292_v61  ;;  %1920 = vrcp.f32 %v1239_v26  ;;  %v1240_v62 = vadd.f32 1.0, %v1915_v59 }
 0x46e   : > { %v1917_v63 = vpop.eup %1916 }
 0x46f   : > { %v1279_v1 = vmul.f32 %v1917_v63, %v1905_v48  ;;  %1922 = vrcp.f32 %v1240_v62 }
 0x470   : > { %v1919_v39 = vpop.eup %1918 }
 0x471   : > { %v1293_v2 = vsel %vm1265_vm11, %v1917_v63, %v1279_v1  ;;  %v1280_v3 = vmul.f32 %v1919_v39, %v1907_v47 }
 0x472   : > { %1307 = vst [vmem:[%s2643_s26 + $0x50] sm:$0xff] %v1293_v2 }
 0x473   : > { %v1294_v51 = vsel %vm1266_vm12, %v1919_v39, %v1280_v3 }
 0x474   : > { %1308 = vst [vmem:[%s2643_s26 + $0x58] sm:$0xff] %v1294_v51 }
 0x477   : > { %v1921_v4 = vpop.eup %1920 }
 0x478   : > { %v1281_v6 = vmul.f32 %v1921_v4, %v1913_v57 }
 0x479   : > { %v1923_v7 = vpop.eup %1922 }
 0x47a   : > { %v1295_v43 = vsel %vm1267_vm13, %v1921_v4, %v1281_v6  ;;  %v1282_v8 = vmul.f32 %v1923_v7, %v1915_v59 }
 0x47b   : > { %1309 = vst [vmem:[%s2643_s26 + $0x60] sm:$0xff] %v1295_v43 }
 0x47c   : > { %v1296_v9 = vsel %vm1268_vm14, %v1923_v7, %v1282_v8 }
 0x47d   : > { %1310 = vst [vmem:[%s2643_s26 + $0x68] sm:$0xff] %v1296_v9 }
 0x47e   : > { %2079 = shalt.err (!%p2076_p13)
}
 0x47f   : > { %s2080_s18 = scalar_lea.hbm %s2694_s17, 1792  ;;  %s2084_s26 = scalar_lea.hbm %s2780_s15, 3584 }
 0x480   : > { %p2081_p9 = scmp.ne.s32.totalorder %s2694_s17, %s2080_s18  ;;  %p2085_p4 = scmp.lt.u32.totalorder %s2694_s17, %s2780_s15 }
 0x481   : > { %p2086_p8 = scmp.lt.u32.totalorder %s2084_s26, %s2080_s18  ;;  %p2088_p3 = scmp.lt.u32.totalorder %s2080_s18, %s2694_s17 }
 0x482   : > { %p2082_p0 = pnand %p2081_p9, %p2375_p10 }
 0x483   : > { %p2087_p6 = por %p2086_p8, %p2085_p4 }
 0x484   : > { %p2083_p11 = pneg %p2082_p0 }
 0x485   : > { %p2089_p5 = por %p2088_p3, %p2087_p6 }
 0x487   : > { %p2090_p7 = pnand %p2089_p5, %p2083_p11 }
 0x489   : > { %2093 = shalt.err (!%p2090_p7)
}
 0x48a   : > { %s2152_s29 = smov 128   ;;  %s2153_s21 = smov 8  }
 0x48b   : > { %1754 = dma.vmem_to_hbm [thread:$0]  (%p2375_p10), %s2696_s23, 1792, %s2694_s17, %s1312_s13, %s2152_s29, %s2152_s29, %s2153_s21  }
 0x48c PF: > { %s2781_s24 = sld [smem:[#allocation16_spill]]  ;;  %s2782_s9 = sld [smem:[#allocation17_spill]] }
 0x48d   : > { %p2784_p1 = scmp.ge.s32.totalorder %s2140_s12, 2 }
 0x492   : > { %s1340_s20 = sand.u32 1, %s2781_s24   ;;  %p2783_p12 = scmp.ne.s32.totalorder %s2782_s9, 0 }
 0x493   : > { %s1341_s18 = scalar_lea.sflag [#allocation4], %s1340_s20 }
 0x494   : > { %p1774_p2 = pnand %p2784_p1, %p2783_p12 }
 0x496   : > { %2123 = dma.done.wait (!%p1774_p2), %s1341_s18, 1792  }
 0x497   : > { %2125 = vsyncadd (!%p1774_p2), %s1341_s18, 4294965504  ;;  %p24_p13 = scmp.ge.s32.totalorder %s2365_s14, 4   ;;  %s2785_s30 = smov %s2132_s10 }
 0x498   : > { %s2786_s10 = smov %s2136_s11  ;;  %s2787_s11 = smov %s2381_s28 }
 0x499   : > { %s2788_s12 = smov %s2365_s14  ;;  %26 = sbr.rel (!%p24_p13) target bundleno = 9 (0x9), region = 117 }
 0x4a0   :  { %1346 = vsyncpa [#allocation3], 1 }
 0x4a1   :  { %1348 = vsyncpa [#allocation3 + $0x1], 1 }
 0x4a2   :  { %1349 = vsyncpa [#allocation6], 1 }
 0x4a3   :  { %1350 = vsyncpa [#allocation9], 1 }
 0x4a4   :  { %1351 = vsyncpa [#allocation4], 1 }
 0x4a5   :  { %1353 = vsyncpa [#allocation4 + $0x1], 1 }

</bundles_post_ra>
